<compile_context>
chip_gen: v5e
topology: v5e:2x2
jax: 0.10.0
libtpu: 0.0.40
codegen_flags: <defaults>
</compile_context>

<pallas_src>
import functools

import jax
import jax.numpy as jnp
from jax.experimental import pallas as pl
from jax.experimental.pallas import tpu as pltpu

# A @ B^T on the MXU (contract the last dim of both operands) — the standard
# "NT" dimension numbers; no transpose is materialized.
_NT = (((1,), (1,)), ((), ()))
_LANE = 128
_SUBLANE = 8


def _round_up(v, m):
    return (v + m - 1) // m * m


def _vmem():
    # Small problem: no grid, whole arrays live in VMEM for a single invocation.
    return pl.BlockSpec(memory_space=pltpu.MemorySpace.VMEM)


# ----------------------- parameter-slab layout (static) -----------------------
def _slab_layout(in_dim, hidden, out_ch, heads):
    """Row layout of the single lane-padded f32 parameter slab.

    Every tensor starts at a sublane-aligned (multiple-of-8) row so the static
    in-kernel slices stay tile-aligned.  Returns
    ({name: (row, rows, cols)}, total_rows, lane_width, padded_output_width).
    """
    ghid = heads * hidden
    out_pad = _round_up(out_ch, _LANE)                 # lane-dense output width
    width = _round_up(max(in_dim, ghid, out_pad), _LANE)
    layout, off = {}, 0

    def place(name, rows, cols):
        nonlocal off
        layout[name] = (off, rows, cols)
        off += _round_up(rows, _SUBLANE)

    place("enc_w", in_dim + 2, in_dim)    # Linear weight (in+2, in)
    place("enc_b", 1, in_dim)
    place("g1_w_t", ghid, in_dim)         # gat1 weight, transposed [H*hid, in]
    place("g1_as_t", heads, ghid)         # block-diag att_src, transposed
    place("g1_ad_t", heads, ghid)         # block-diag att_dst, transposed
    place("g1_b", 1, ghid)
    place("g2_w_t", out_pad, ghid)        # gat2 weight, transposed, zero-padded rows
    place("g2_as", 1, out_pad)            # zero-padded columns
    place("g2_ad", 1, out_pad)
    place("g2_b", 1, out_pad)
    return layout, _round_up(off, _SUBLANE), width, out_pad


def prep_kernel_params(params):
    """One-time layout prep: pack the 10 small parameter tensors into a single
    lane-padded f32 slab (1 HBM->VMEM DMA instead of 11)."""
    in_dim = params["enc_w"].shape[1]
    heads, hidden = params["g1_as"].shape
    out_ch = params["g2_as"].shape[1]
    layout, rows, width, _ = _slab_layout(in_dim, hidden, out_ch, heads)

    def blk_diag(att):                                 # [H, C] -> [H*C, H]
        h, c = att.shape
        eye = jnp.eye(h, dtype=att.dtype)
        return (att[:, :, None] * eye[:, None, :]).reshape(h * c, h)

    tensors = {
        "enc_w": params["enc_w"],
        "enc_b": params["enc_b"],
        "g1_w_t": params["g1_w"].T,
        "g1_as_t": blk_diag(params["g1_as"]).T,        # [H, H*hid]
        "g1_ad_t": blk_diag(params["g1_ad"]).T,        # [H, H*hid]
        "g1_b": params["g1_b"],
        "g2_w_t": params["g2_w"].T,                    # [out, H*hid]; padded rows stay 0
        "g2_as": params["g2_as"],                      # [1, out];   padded cols stay 0
        "g2_ad": params["g2_ad"],
        "g2_b": params["g2_b"],
    }
    slab = jnp.zeros((rows, width), jnp.float32)
    for name, (row, _, _) in layout.items():
        t = tensors[name].astype(jnp.float32)
        slab = slab.at[row:row + t.shape[0], 0:t.shape[1]].set(t)
    return slab


# ------------------------------ fused kernel ----------------------------------
def _fused_gnn_kernel(edge_ref, x_ref, attr_ref, p_ref, o_ref, *,
                      heads, hidden, out_pad, in_dim, encode, layout,
                      bf16_features):
    f32 = jnp.float32
    bf16 = jnp.bfloat16
    feat_dt = bf16 if bf16_features else f32
    n = x_ref.shape[0]
    e = edge_ref.shape[1]
    slope = f32(0.2)

    def param(name):                                   # static slab slice: zero cost
        row, r, c = layout[name]
        return p_ref[row:row + r, 0:c]

    # ---- adjacency mask built in-kernel from the raw edge list ---------------
    # one-hot dst/src matrices (0/1: exact in bf16) -> adj = dmat @ smat^T (MXU).
    node_iota = jax.lax.broadcasted_iota(jnp.int32, (n, e), 0)            # [N, E]
    dmat = (node_iota == edge_ref[1:2, :]).astype(bf16)                   # dst one-hot
    smat = (node_iota == edge_ref[0:1, :]).astype(bf16)                   # src one-hot
    adj = jax.lax.dot_general(dmat, smat, _NT,
                              preferred_element_type=f32)                 # [N_dst, N_src]
    ri = jax.lax.broadcasted_iota(jnp.int32, (n, n), 0)
    ci = jax.lax.broadcasted_iota(jnp.int32, (n, n), 1)
    has_edge = jnp.logical_or(adj > 0.5, ri == ci)                        # add self loops
    # Non-edge mask: computed ONCE, shared by both GAT layers and all heads.
    neg_mask = jnp.where(has_edge, f32(0.0), f32(-1e30))                  # [N, N]

    # ---- node encoder: Linear(in_dim + 2 -> in_dim) --------------------------
    # The torch-side concat([x, node_attr]) is folded into a split matmul: the
    # two attr columns become rank-1 (outer-product) updates on the VPU (f32).
    if encode:
        enc_w = param("enc_w")                                            # [in+2, in]
        h = (jnp.dot(x_ref[...].astype(feat_dt), enc_w[0:in_dim, :].astype(feat_dt),
                     preferred_element_type=f32) + param("enc_b"))
        for t in range(attr_ref.shape[1]):                                # static (== 2)
            h = h + attr_ref[:, t:t + 1] * enc_w[in_dim + t:in_dim + t + 1, :]
    else:
        h = x_ref[...]
    # F.dropout: identity in eval mode.

    def gat(x, w_t, as_t, ad_t, b, nheads, c, concat):
        # x @ W via NT dot_general against the transposed weight slab slice.
        xw = jax.lax.dot_general(x.astype(feat_dt), w_t.astype(feat_dt), _NT,
                                 preferred_element_type=f32)              # [N, H*C]
        # All-head attention scores via two small f32 MXU matmuls against the
        # block-diagonal attention matrices (kept f32: tiny, and they feed exp):
        #   a_src[h, j] = <xw[j, hC:(h+1)C], att_src[h]>  (node index on lanes)
        #   a_dst[i, h] = <xw[i, hC:(h+1)C], att_dst[h]>  (node index on sublanes)
        a_src = jax.lax.dot_general(as_t, xw, _NT, preferred_element_type=f32)  # [H, N]
        a_dst = jax.lax.dot_general(xw, ad_t, _NT, preferred_element_type=f32)  # [N, H]
        outs = []
        for hh in range(nheads):                     # static unroll; H is small
            # logits[i, j] = a_dst[i, h] + a_src[j, h] : [N,1] + [1,N] broadcast
            logits = a_dst[:, hh:hh + 1] + a_src[hh:hh + 1, :]            # [N, N]
            logits = jnp.where(logits >= 0, logits, slope * logits)       # LeakyReLU(0.2)
            logits = logits + neg_mask                                    # mask non-edges
            m = jnp.max(logits, axis=-1, keepdims=True)
            p = jnp.exp(logits - m)
            # softmax divide on the EUP (approx reciprocal, free next to the exp)
            alpha = p * pl.reciprocal(jnp.sum(p, axis=-1, keepdims=True), approx=True)
            # attention dropout: identity in eval mode.
            # bf16 aggregation matmul: alpha in [0,1] -> rounding ~0.2%, safe.
            outs.append(jnp.dot(alpha.astype(bf16),
                                xw[:, hh * c:(hh + 1) * c].astype(bf16),
                                preferred_element_type=f32))              # [N, C]
        if concat:
            out = jnp.concatenate(outs, axis=-1)
        elif nheads == 1:
            out = outs[0]
        else:
            out = sum(outs) * (1.0 / nheads)
        return out + b

    h = gat(h, param("g1_w_t"), param("g1_as_t"), param("g1_ad_t"), param("g1_b"),
            heads, hidden, True)
    h = jnp.where(h > 0, h, jnp.exp(jnp.minimum(h, 0.0)) - 1.0)           # ELU(alpha=1)
    # F.dropout: identity in eval mode.
    h = gat(h, param("g2_w_t"), param("g2_as"), param("g2_ad"), param("g2_b"),
            1, out_pad, False)
    # Lane-dense store: gat2 params were zero-padded to out_pad columns, so h is
    # natively [N, out_pad] (out_pad % 128 == 0); the wrapper slices the padding.
    o_ref[...] = h


# ------------------------------ wrapper / glue --------------------------------
@functools.partial(jax.jit, static_argnames=("heads", "hidden_dim", "output_dim",
                                             "bf16_features"))
def conversation_gnn_forward(param_slab, x, edge_index, node_attr=None, *,
                             heads, hidden_dim, output_dim, bf16_features=False):
    """Fused ConversationGNN.forward (eval mode) as one Pallas kernel call."""
    n, in_dim = x.shape
    encode = node_attr is not None
    if node_attr is None:
        node_attr = jnp.zeros((n, 2), jnp.float32)   # unused when encode=False
    layout, rows, width, out_pad = _slab_layout(in_dim, hidden_dim, output_dim, heads)
    assert param_slab.shape == (rows, width), "param slab does not match model dims"
    kernel = functools.partial(
        _fused_gnn_kernel, heads=heads, hidden=hidden_dim, out_pad=out_pad,
        in_dim=in_dim, encode=encode, layout=layout, bf16_features=bf16_features)
    out = pl.pallas_call(
        kernel,
        out_shape=jax.ShapeDtypeStruct((n, out_pad), jnp.float32),
        in_specs=[_vmem()] * 4,
        out_specs=_vmem(),
    )(edge_index.astype(jnp.int32), x, node_attr, param_slab)
    return out[:, :output_dim]                        # drop lane padding outside kernel


# ------------------------ deterministic parameter init ------------------------
def init_params(key, input_dim, hidden_dim, output_dim, heads):
    ks = jax.random.split(key, 8)

    def glorot(k, shape):
        lim = jnp.sqrt(6.0 / (shape[0] + shape[-1]))
        return jax.random.uniform(k, shape, jnp.float32, -lim, lim)

    return {
        "enc_w": glorot(ks[0], (input_dim + 2, input_dim)),   # Linear weight (transposed)
        "enc_b": glorot(ks[1], (1, input_dim)),
        "g1_w": glorot(ks[2], (input_dim, heads * hidden_dim)),
        "g1_as": glorot(ks[3], (heads, hidden_dim)),
        "g1_ad": glorot(ks[4], (heads, hidden_dim)),
        "g1_b": jnp.zeros((1, heads * hidden_dim), jnp.float32),
        "g2_w": glorot(ks[5], (heads * hidden_dim, output_dim)),
        "g2_as": glorot(ks[6], (1, output_dim)),
        "g2_ad": glorot(ks[7], (1, output_dim)),
        "g2_b": jnp.zeros((1, output_dim), jnp.float32),
    }


# ------------------------------ pure-JAX reference ----------------------------
def _gat_ref(x, w, att_src, att_dst, bias, adj, heads, out_ch, concat, apply_elu):
    hp = jax.lax.Precision.HIGHEST
    n = x.shape[0]
    xw = jnp.dot(x, w, precision=hp).reshape(n, heads, out_ch)
    a_src = jnp.sum(xw * att_src[None], axis=-1)                 # [N, H]
    a_dst = jnp.sum(xw * att_dst[None], axis=-1)
    logits = a_dst[:, None, :] + a_src[None, :, :]               # [dst, src, H]
    logits = jnp.where(logits >= 0, logits, 0.2 * logits)
    logits = jnp.where(adj[..., None] > 0, logits, -1e30)
    alpha = jax.nn.softmax(logits, axis=1)
    out = jnp.einsum("ijh,jhc->ihc", alpha, xw, precision=hp)
    out = out.reshape(n, heads * out_ch) if concat else out.mean(axis=1)
    out = out + bias
    if apply_elu:
        out = jnp.where(out > 0, out, jnp.exp(jnp.minimum(out, 0.0)) - 1.0)
    return out


if __name__ == "__main__":
    N, IN_DIM, HID, OUT, HEADS = 16, 64, 32, 16, 4
    key = jax.random.PRNGKey(0)
    kkey, kx, ka = jax.random.split(key, 3)
    params = init_params(kkey, IN_DIM, HID, OUT, HEADS)
    param_slab = prep_kernel_params(params)              # one-time layout prep (1 slab)

    x = jax.random.normal(kx, (N, IN_DIM), jnp.float32)
    node_attr = jax.random.normal(ka, (N, 2), jnp.float32)
    fwd_src, fwd_dst = jnp.arange(N - 1), jnp.arange(1, N)
    skip_src, skip_dst = jnp.arange(N - 4), jnp.arange(4, N)
    edge_index = jnp.stack([jnp.concatenate([fwd_src, fwd_dst, skip_src]),
                            jnp.concatenate([fwd_dst, fwd_src, skip_dst])]).astype(jnp.int32)

    out = conversation_gnn_forward(param_slab, x, edge_index, node_attr,
                                   heads=HEADS, hidden_dim=HID, output_dim=OUT)
    out = jax.block_until_ready(out)

    # Reference check (plain JAX, highest precision matmuls, scatter-built adj).
    src, dst = edge_index
    adj = jnp.zeros((N, N), jnp.float32).at[dst, src].set(1.0)
    adj = adj.at[jnp.arange(N), jnp.arange(N)].set(1.0)
    h = jnp.dot(jnp.concatenate([x, node_attr], -1), params["enc_w"],
                precision=jax.lax.Precision.HIGHEST) + params["enc_b"]
    h = _gat_ref(h, params["g1_w"], params["g1_as"], params["g1_ad"],
                 params["g1_b"], adj, HEADS, HID, True, True)
    ref = _gat_ref(h, params["g2_w"], params["g2_as"], params["g2_ad"],
                   params["g2_b"], adj, 1, OUT, False, False)

    assert out.shape == (N, OUT)
    assert bool(jnp.all(jnp.isfinite(out)))
    assert bool(jnp.allclose(out, ref, atol=2e-2, rtol=2e-2)), \
        float(jnp.max(jnp.abs(out - ref)))

    # Optional throughput mode (v6e/v7x large-N): bf16 feature matmuls too.
    out_bf16 = conversation_gnn_forward(param_slab, x, edge_index, node_attr,
                                        heads=HEADS, hidden_dim=HID, output_dim=OUT,
                                        bf16_features=True)
    out_bf16 = jax.block_until_ready(out_bf16)
    assert bool(jnp.all(jnp.isfinite(out_bf16)))
    assert bool(jnp.allclose(out_bf16, ref, atol=1e-1, rtol=1e-1)), \
        float(jnp.max(jnp.abs(out_bf16 - ref)))
    print("KERNEL_OK")
</pallas_src>

<mosaic_0001>
module attributes {stable_mosaic.version = 11 : i64} {
  func.func @_fused_gnn_kernel(%arg0: memref<2x42xi32, #tpu.memory_space<vmem>>, %arg1: memref<16x64xf32, #tpu.memory_space<vmem>>, %arg2: memref<16x2xf32, #tpu.memory_space<vmem>>, %arg3: memref<384x128xf32, #tpu.memory_space<vmem>>, %arg4: memref<16x128xf32, #tpu.memory_space<vmem>>) attributes {dimension_semantics = [], scalar_prefetch = 0 : i64, scratch_operands = 0 : i64, tpu.core_type = #tpu.core_type<tc>} {
    %0 = tpu.iota {dimensions = array<i32: 0>} : vector<16x42xi32>
    %c1 = arith.constant 1 : index
    %c0 = arith.constant 0 : index
    %1 = vector.load %arg0[%c1, %c0] : memref<2x42xi32, #tpu.memory_space<vmem>>, vector<1x42xi32>
    %2 = vector.broadcast %1 : vector<1x42xi32> to vector<16x42xi32>
    %3 = arith.cmpi eq, %0, %2 : vector<16x42xi32>
    %4 = arith.extui %3 : vector<16x42xi1> to vector<16x42xi32>
    %5 = arith.sitofp %4 : vector<16x42xi32> to vector<16x42xf32>
    %6 = arith.truncf %5 : vector<16x42xf32> to vector<16x42xbf16>
    %c0_0 = arith.constant 0 : index
    %c0_1 = arith.constant 0 : index
    %7 = vector.load %arg0[%c0_0, %c0_1] : memref<2x42xi32, #tpu.memory_space<vmem>>, vector<1x42xi32>
    %8 = vector.broadcast %7 : vector<1x42xi32> to vector<16x42xi32>
    %9 = arith.cmpi eq, %0, %8 : vector<16x42xi32>
    %10 = arith.extui %9 : vector<16x42xi1> to vector<16x42xi32>
    %11 = arith.sitofp %10 : vector<16x42xi32> to vector<16x42xf32>
    %12 = arith.truncf %11 : vector<16x42xf32> to vector<16x42xbf16>
    %cst = arith.constant dense<0.000000e+00> : vector<16x16xf32>
    %13 = tpu.matmul %6, %12, %cst {dimension_numbers = #tpu.dot_dimension_numbers<[1], [1], [0], [0], [0, 0, 1, 0], [], []>} : vector<16x42xbf16>, vector<16x42xbf16>, vector<16x16xf32> -> vector<16x16xf32>
    %14 = tpu.iota {dimensions = array<i32: 0>} : vector<16x16xi32>
    %15 = tpu.iota {dimensions = array<i32: 1>} : vector<16x16xi32>
    %cst_2 = arith.constant 5.000000e-01 : f32
    %16 = vector.broadcast %cst_2 : f32 to vector<16x16xf32>
    %17 = arith.cmpf ogt, %13, %16 : vector<16x16xf32>
    %18 = arith.cmpi eq, %14, %15 : vector<16x16xi32>
    %19 = arith.ori %17, %18 : vector<16x16xi1>
    %cst_3 = arith.constant 0.000000e+00 : f32
    %cst_4 = arith.constant -1.000000e+30 : f32
    %20 = vector.broadcast %cst_3 : f32 to vector<16x16xf32>
    %21 = vector.broadcast %cst_4 : f32 to vector<16x16xf32>
    %22 = arith.select %19, %20, %21 : vector<16x16xi1>, vector<16x16xf32>
    %c0_5 = arith.constant 0 : index
    %c0_6 = arith.constant 0 : index
    %23 = vector.load %arg3[%c0_5, %c0_6] : memref<384x128xf32, #tpu.memory_space<vmem>>, vector<66x64xf32>
    %c0_7 = arith.constant 0 : index
    %c0_8 = arith.constant 0 : index
    %24 = vector.load %arg1[%c0_7, %c0_8] : memref<16x64xf32, #tpu.memory_space<vmem>>, vector<16x64xf32>
    %25 = vector.extract_strided_slice %23 {offsets = [0, 0], sizes = [64, 64], strides = [1, 1]} : vector<66x64xf32> to vector<64x64xf32>
    %cst_9 = arith.constant dense<0.000000e+00> : vector<16x64xf32>
    %26 = tpu.matmul %24, %25, %cst_9 {dimension_numbers = #tpu.dot_dimension_numbers<[1], [0], [0], [1], [0, 0, 1, 1], [], []>} : vector<16x64xf32>, vector<64x64xf32>, vector<16x64xf32> -> vector<16x64xf32>
    %c72 = arith.constant 72 : index
    %c0_10 = arith.constant 0 : index
    %27 = vector.load %arg3[%c72, %c0_10] : memref<384x128xf32, #tpu.memory_space<vmem>>, vector<1x64xf32>
    %28 = vector.broadcast %27 : vector<1x64xf32> to vector<16x64xf32>
    %29 = arith.addf %26, %28 : vector<16x64xf32>
    %c0_11 = arith.constant 0 : index
    %c0_12 = arith.constant 0 : index
    %30 = vector.load %arg2[%c0_11, %c0_12] : memref<16x2xf32, #tpu.memory_space<vmem>>, vector<16x1xf32>
    %31 = vector.extract_strided_slice %23 {offsets = [64, 0], sizes = [1, 64], strides = [1, 1]} : vector<66x64xf32> to vector<1x64xf32>
    %32 = vector.broadcast %30 : vector<16x1xf32> to vector<16x64xf32>
    %33 = vector.broadcast %31 : vector<1x64xf32> to vector<16x64xf32>
    %34 = arith.mulf %32, %33 : vector<16x64xf32>
    %35 = arith.addf %29, %34 : vector<16x64xf32>
    %c0_13 = arith.constant 0 : index
    %c1_14 = arith.constant 1 : index
    %36 = vector.load %arg2[%c0_13, %c1_14] : memref<16x2xf32, #tpu.memory_space<vmem>>, vector<16x1xf32>
    %37 = vector.extract_strided_slice %23 {offsets = [65, 0], sizes = [1, 64], strides = [1, 1]} : vector<66x64xf32> to vector<1x64xf32>
    %38 = vector.broadcast %36 : vector<16x1xf32> to vector<16x64xf32>
    %39 = vector.broadcast %37 : vector<1x64xf32> to vector<16x64xf32>
    %40 = arith.mulf %38, %39 : vector<16x64xf32>
    %41 = arith.addf %35, %40 : vector<16x64xf32>
    %c80 = arith.constant 80 : index
    %c0_15 = arith.constant 0 : index
    %42 = vector.load %arg3[%c80, %c0_15] : memref<384x128xf32, #tpu.memory_space<vmem>>, vector<128x64xf32>
    %c208 = arith.constant 208 : index
    %c0_16 = arith.constant 0 : index
    %43 = vector.load %arg3[%c208, %c0_16] : memref<384x128xf32, #tpu.memory_space<vmem>>, vector<4x128xf32>
    %c216 = arith.constant 216 : index
    %c0_17 = arith.constant 0 : index
    %44 = vector.load %arg3[%c216, %c0_17] : memref<384x128xf32, #tpu.memory_space<vmem>>, vector<4x128xf32>
    %c224 = arith.constant 224 : index
    %c0_18 = arith.constant 0 : index
    %45 = vector.load %arg3[%c224, %c0_18] : memref<384x128xf32, #tpu.memory_space<vmem>>, vector<1x128xf32>
    %cst_19 = arith.constant dense<0.000000e+00> : vector<16x128xf32>
    %46 = tpu.matmul %41, %42, %cst_19 {dimension_numbers = #tpu.dot_dimension_numbers<[1], [1], [0], [0], [0, 0, 1, 0], [], []>} : vector<16x64xf32>, vector<128x64xf32>, vector<16x128xf32> -> vector<16x128xf32>
    %cst_20 = arith.constant dense<0.000000e+00> : vector<4x16xf32>
    %47 = tpu.matmul %43, %46, %cst_20 {dimension_numbers = #tpu.dot_dimension_numbers<[1], [1], [0], [0], [0, 0, 1, 0], [], []>} : vector<4x128xf32>, vector<16x128xf32>, vector<4x16xf32> -> vector<4x16xf32>
    %cst_21 = arith.constant dense<0.000000e+00> : vector<16x4xf32>
    %48 = tpu.matmul %46, %44, %cst_21 {dimension_numbers = #tpu.dot_dimension_numbers<[1], [1], [0], [0], [0, 0, 1, 0], [], []>} : vector<16x128xf32>, vector<4x128xf32>, vector<16x4xf32> -> vector<16x4xf32>
    %49 = vector.extract_strided_slice %48 {offsets = [0, 0], sizes = [16, 1], strides = [1, 1]} : vector<16x4xf32> to vector<16x1xf32>
    %50 = vector.extract_strided_slice %47 {offsets = [0, 0], sizes = [1, 16], strides = [1, 1]} : vector<4x16xf32> to vector<1x16xf32>
    %51 = vector.broadcast %49 : vector<16x1xf32> to vector<16x16xf32>
    %52 = vector.broadcast %50 : vector<1x16xf32> to vector<16x16xf32>
    %53 = arith.addf %51, %52 : vector<16x16xf32>
    %cst_22 = arith.constant 0.000000e+00 : f32
    %54 = vector.broadcast %cst_22 : f32 to vector<16x16xf32>
    %55 = arith.cmpf oge, %53, %54 : vector<16x16xf32>
    %cst_23 = arith.constant 2.000000e-01 : f32
    %56 = vector.broadcast %cst_23 : f32 to vector<16x16xf32>
    %57 = arith.mulf %56, %53 : vector<16x16xf32>
    %58 = arith.select %55, %53, %57 : vector<16x16xi1>, vector<16x16xf32>
    %59 = arith.addf %58, %22 : vector<16x16xf32>
    %cst_24 = arith.constant dense<0xFF800000> : vector<16xf32>
    %60 = vector.multi_reduction <maximumf>, %59, %cst_24 [1] : vector<16x16xf32> to vector<16xf32>
    %61 = vector.shape_cast %60 : vector<16xf32> to vector<16x1xf32>
    %62 = vector.broadcast %61 : vector<16x1xf32> to vector<16x16xf32>
    %63 = arith.subf %59, %62 : vector<16x16xf32>
    %64 = math.exp %63 : vector<16x16xf32>
    %cst_25 = arith.constant dense<0.000000e+00> : vector<16xf32>
    %65 = vector.multi_reduction <add>, %64, %cst_25 [1] : vector<16x16xf32> to vector<16xf32>
    %66 = vector.shape_cast %65 : vector<16xf32> to vector<16x1xf32>
    %67 = tpu.reciprocal %66 {approx = true} : vector<16x1xf32> -> vector<16x1xf32>
    %68 = vector.broadcast %67 : vector<16x1xf32> to vector<16x16xf32>
    %69 = arith.mulf %64, %68 : vector<16x16xf32>
    %70 = arith.truncf %69 : vector<16x16xf32> to vector<16x16xbf16>
    %71 = vector.extract_strided_slice %46 {offsets = [0, 0], sizes = [16, 32], strides = [1, 1]} : vector<16x128xf32> to vector<16x32xf32>
    %72 = arith.truncf %71 : vector<16x32xf32> to vector<16x32xbf16>
    %cst_26 = arith.constant dense<0.000000e+00> : vector<16x32xf32>
    %73 = tpu.matmul %70, %72, %cst_26 {dimension_numbers = #tpu.dot_dimension_numbers<[1], [0], [0], [1], [0, 0, 1, 1], [], []>} : vector<16x16xbf16>, vector<16x32xbf16>, vector<16x32xf32> -> vector<16x32xf32>
    %74 = vector.extract_strided_slice %48 {offsets = [0, 1], sizes = [16, 1], strides = [1, 1]} : vector<16x4xf32> to vector<16x1xf32>
    %75 = vector.extract_strided_slice %47 {offsets = [1, 0], sizes = [1, 16], strides = [1, 1]} : vector<4x16xf32> to vector<1x16xf32>
    %76 = vector.broadcast %74 : vector<16x1xf32> to vector<16x16xf32>
    %77 = vector.broadcast %75 : vector<1x16xf32> to vector<16x16xf32>
    %78 = arith.addf %76, %77 : vector<16x16xf32>
    %cst_27 = arith.constant 0.000000e+00 : f32
    %79 = vector.broadcast %cst_27 : f32 to vector<16x16xf32>
    %80 = arith.cmpf oge, %78, %79 : vector<16x16xf32>
    %cst_28 = arith.constant 2.000000e-01 : f32
    %81 = vector.broadcast %cst_28 : f32 to vector<16x16xf32>
    %82 = arith.mulf %81, %78 : vector<16x16xf32>
    %83 = arith.select %80, %78, %82 : vector<16x16xi1>, vector<16x16xf32>
    %84 = arith.addf %83, %22 : vector<16x16xf32>
    %cst_29 = arith.constant dense<0xFF800000> : vector<16xf32>
    %85 = vector.multi_reduction <maximumf>, %84, %cst_29 [1] : vector<16x16xf32> to vector<16xf32>
    %86 = vector.shape_cast %85 : vector<16xf32> to vector<16x1xf32>
    %87 = vector.broadcast %86 : vector<16x1xf32> to vector<16x16xf32>
    %88 = arith.subf %84, %87 : vector<16x16xf32>
    %89 = math.exp %88 : vector<16x16xf32>
    %cst_30 = arith.constant dense<0.000000e+00> : vector<16xf32>
    %90 = vector.multi_reduction <add>, %89, %cst_30 [1] : vector<16x16xf32> to vector<16xf32>
    %91 = vector.shape_cast %90 : vector<16xf32> to vector<16x1xf32>
    %92 = tpu.reciprocal %91 {approx = true} : vector<16x1xf32> -> vector<16x1xf32>
    %93 = vector.broadcast %92 : vector<16x1xf32> to vector<16x16xf32>
    %94 = arith.mulf %89, %93 : vector<16x16xf32>
    %95 = arith.truncf %94 : vector<16x16xf32> to vector<16x16xbf16>
    %96 = vector.extract_strided_slice %46 {offsets = [0, 32], sizes = [16, 32], strides = [1, 1]} : vector<16x128xf32> to vector<16x32xf32>
    %97 = arith.truncf %96 : vector<16x32xf32> to vector<16x32xbf16>
    %cst_31 = arith.constant dense<0.000000e+00> : vector<16x32xf32>
    %98 = tpu.matmul %95, %97, %cst_31 {dimension_numbers = #tpu.dot_dimension_numbers<[1], [0], [0], [1], [0, 0, 1, 1], [], []>} : vector<16x16xbf16>, vector<16x32xbf16>, vector<16x32xf32> -> vector<16x32xf32>
    %99 = vector.extract_strided_slice %48 {offsets = [0, 2], sizes = [16, 1], strides = [1, 1]} : vector<16x4xf32> to vector<16x1xf32>
    %100 = vector.extract_strided_slice %47 {offsets = [2, 0], sizes = [1, 16], strides = [1, 1]} : vector<4x16xf32> to vector<1x16xf32>
    %101 = vector.broadcast %99 : vector<16x1xf32> to vector<16x16xf32>
    %102 = vector.broadcast %100 : vector<1x16xf32> to vector<16x16xf32>
    %103 = arith.addf %101, %102 : vector<16x16xf32>
    %cst_32 = arith.constant 0.000000e+00 : f32
    %104 = vector.broadcast %cst_32 : f32 to vector<16x16xf32>
    %105 = arith.cmpf oge, %103, %104 : vector<16x16xf32>
    %cst_33 = arith.constant 2.000000e-01 : f32
    %106 = vector.broadcast %cst_33 : f32 to vector<16x16xf32>
    %107 = arith.mulf %106, %103 : vector<16x16xf32>
    %108 = arith.select %105, %103, %107 : vector<16x16xi1>, vector<16x16xf32>
    %109 = arith.addf %108, %22 : vector<16x16xf32>
    %cst_34 = arith.constant dense<0xFF800000> : vector<16xf32>
    %110 = vector.multi_reduction <maximumf>, %109, %cst_34 [1] : vector<16x16xf32> to vector<16xf32>
    %111 = vector.shape_cast %110 : vector<16xf32> to vector<16x1xf32>
    %112 = vector.broadcast %111 : vector<16x1xf32> to vector<16x16xf32>
    %113 = arith.subf %109, %112 : vector<16x16xf32>
    %114 = math.exp %113 : vector<16x16xf32>
    %cst_35 = arith.constant dense<0.000000e+00> : vector<16xf32>
    %115 = vector.multi_reduction <add>, %114, %cst_35 [1] : vector<16x16xf32> to vector<16xf32>
    %116 = vector.shape_cast %115 : vector<16xf32> to vector<16x1xf32>
    %117 = tpu.reciprocal %116 {approx = true} : vector<16x1xf32> -> vector<16x1xf32>
    %118 = vector.broadcast %117 : vector<16x1xf32> to vector<16x16xf32>
    %119 = arith.mulf %114, %118 : vector<16x16xf32>
    %120 = arith.truncf %119 : vector<16x16xf32> to vector<16x16xbf16>
    %121 = vector.extract_strided_slice %46 {offsets = [0, 64], sizes = [16, 32], strides = [1, 1]} : vector<16x128xf32> to vector<16x32xf32>
    %122 = arith.truncf %121 : vector<16x32xf32> to vector<16x32xbf16>
    %cst_36 = arith.constant dense<0.000000e+00> : vector<16x32xf32>
    %123 = tpu.matmul %120, %122, %cst_36 {dimension_numbers = #tpu.dot_dimension_numbers<[1], [0], [0], [1], [0, 0, 1, 1], [], []>} : vector<16x16xbf16>, vector<16x32xbf16>, vector<16x32xf32> -> vector<16x32xf32>
    %124 = vector.extract_strided_slice %48 {offsets = [0, 3], sizes = [16, 1], strides = [1, 1]} : vector<16x4xf32> to vector<16x1xf32>
    %125 = vector.extract_strided_slice %47 {offsets = [3, 0], sizes = [1, 16], strides = [1, 1]} : vector<4x16xf32> to vector<1x16xf32>
    %126 = vector.broadcast %124 : vector<16x1xf32> to vector<16x16xf32>
    %127 = vector.broadcast %125 : vector<1x16xf32> to vector<16x16xf32>
    %128 = arith.addf %126, %127 : vector<16x16xf32>
    %cst_37 = arith.constant 0.000000e+00 : f32
    %129 = vector.broadcast %cst_37 : f32 to vector<16x16xf32>
    %130 = arith.cmpf oge, %128, %129 : vector<16x16xf32>
    %cst_38 = arith.constant 2.000000e-01 : f32
    %131 = vector.broadcast %cst_38 : f32 to vector<16x16xf32>
    %132 = arith.mulf %131, %128 : vector<16x16xf32>
    %133 = arith.select %130, %128, %132 : vector<16x16xi1>, vector<16x16xf32>
    %134 = arith.addf %133, %22 : vector<16x16xf32>
    %cst_39 = arith.constant dense<0xFF800000> : vector<16xf32>
    %135 = vector.multi_reduction <maximumf>, %134, %cst_39 [1] : vector<16x16xf32> to vector<16xf32>
    %136 = vector.shape_cast %135 : vector<16xf32> to vector<16x1xf32>
    %137 = vector.broadcast %136 : vector<16x1xf32> to vector<16x16xf32>
    %138 = arith.subf %134, %137 : vector<16x16xf32>
    %139 = math.exp %138 : vector<16x16xf32>
    %cst_40 = arith.constant dense<0.000000e+00> : vector<16xf32>
    %140 = vector.multi_reduction <add>, %139, %cst_40 [1] : vector<16x16xf32> to vector<16xf32>
    %141 = vector.shape_cast %140 : vector<16xf32> to vector<16x1xf32>
    %142 = tpu.reciprocal %141 {approx = true} : vector<16x1xf32> -> vector<16x1xf32>
    %143 = vector.broadcast %142 : vector<16x1xf32> to vector<16x16xf32>
    %144 = arith.mulf %139, %143 : vector<16x16xf32>
    %145 = arith.truncf %144 : vector<16x16xf32> to vector<16x16xbf16>
    %146 = vector.extract_strided_slice %46 {offsets = [0, 96], sizes = [16, 32], strides = [1, 1]} : vector<16x128xf32> to vector<16x32xf32>
    %147 = arith.truncf %146 : vector<16x32xf32> to vector<16x32xbf16>
    %cst_41 = arith.constant dense<0.000000e+00> : vector<16x32xf32>
    %148 = tpu.matmul %145, %147, %cst_41 {dimension_numbers = #tpu.dot_dimension_numbers<[1], [0], [0], [1], [0, 0, 1, 1], [], []>} : vector<16x16xbf16>, vector<16x32xbf16>, vector<16x32xf32> -> vector<16x32xf32>
    %149 = tpu.concatenate %73, %98, %123, %148 in 1 : vector<16x32xf32>, vector<16x32xf32>, vector<16x32xf32>, vector<16x32xf32> -> vector<16x128xf32>
    %150 = vector.broadcast %45 : vector<1x128xf32> to vector<16x128xf32>
    %151 = arith.addf %149, %150 : vector<16x128xf32>
    %cst_42 = arith.constant 0.000000e+00 : f32
    %152 = vector.broadcast %cst_42 : f32 to vector<16x128xf32>
    %153 = arith.cmpf ogt, %151, %152 : vector<16x128xf32>
    %cst_43 = arith.constant 0.000000e+00 : f32
    %154 = vector.broadcast %cst_43 : f32 to vector<16x128xf32>
    %155 = arith.minimumf %151, %154 : vector<16x128xf32>
    %156 = math.exp %155 : vector<16x128xf32>
    %cst_44 = arith.constant 1.000000e+00 : f32
    %157 = vector.broadcast %cst_44 : f32 to vector<16x128xf32>
    %158 = arith.subf %156, %157 : vector<16x128xf32>
    %159 = arith.select %153, %151, %158 : vector<16x128xi1>, vector<16x128xf32>
    %c232 = arith.constant 232 : index
    %c0_45 = arith.constant 0 : index
    %160 = vector.load %arg3[%c232, %c0_45] : memref<384x128xf32, #tpu.memory_space<vmem>>, vector<128x128xf32>
    %c360 = arith.constant 360 : index
    %c0_46 = arith.constant 0 : index
    %161 = vector.load %arg3[%c360, %c0_46] : memref<384x128xf32, #tpu.memory_space<vmem>>, vector<1x128xf32>
    %c368 = arith.constant 368 : index
    %c0_47 = arith.constant 0 : index
    %162 = vector.load %arg3[%c368, %c0_47] : memref<384x128xf32, #tpu.memory_space<vmem>>, vector<1x128xf32>
    %c376 = arith.constant 376 : index
    %c0_48 = arith.constant 0 : index
    %163 = vector.load %arg3[%c376, %c0_48] : memref<384x128xf32, #tpu.memory_space<vmem>>, vector<1x128xf32>
    %cst_49 = arith.constant dense<0.000000e+00> : vector<16x128xf32>
    %164 = tpu.matmul %159, %160, %cst_49 {dimension_numbers = #tpu.dot_dimension_numbers<[1], [1], [0], [0], [0, 0, 1, 0], [], []>} : vector<16x128xf32>, vector<128x128xf32>, vector<16x128xf32> -> vector<16x128xf32>
    %cst_50 = arith.constant dense<0.000000e+00> : vector<1x16xf32>
    %165 = tpu.matmul %161, %164, %cst_50 {dimension_numbers = #tpu.dot_dimension_numbers<[1], [1], [0], [0], [0, 0, 1, 0], [], []>} : vector<1x128xf32>, vector<16x128xf32>, vector<1x16xf32> -> vector<1x16xf32>
    %cst_51 = arith.constant dense<0.000000e+00> : vector<16x1xf32>
    %166 = tpu.matmul %164, %162, %cst_51 {dimension_numbers = #tpu.dot_dimension_numbers<[1], [1], [0], [0], [0, 0, 1, 0], [], []>} : vector<16x128xf32>, vector<1x128xf32>, vector<16x1xf32> -> vector<16x1xf32>
    %167 = vector.broadcast %166 : vector<16x1xf32> to vector<16x16xf32>
    %168 = vector.broadcast %165 : vector<1x16xf32> to vector<16x16xf32>
    %169 = arith.addf %167, %168 : vector<16x16xf32>
    %cst_52 = arith.constant 0.000000e+00 : f32
    %170 = vector.broadcast %cst_52 : f32 to vector<16x16xf32>
    %171 = arith.cmpf oge, %169, %170 : vector<16x16xf32>
    %cst_53 = arith.constant 2.000000e-01 : f32
    %172 = vector.broadcast %cst_53 : f32 to vector<16x16xf32>
    %173 = arith.mulf %172, %169 : vector<16x16xf32>
    %174 = arith.select %171, %169, %173 : vector<16x16xi1>, vector<16x16xf32>
    %175 = arith.addf %174, %22 : vector<16x16xf32>
    %cst_54 = arith.constant dense<0xFF800000> : vector<16xf32>
    %176 = vector.multi_reduction <maximumf>, %175, %cst_54 [1] : vector<16x16xf32> to vector<16xf32>
    %177 = vector.shape_cast %176 : vector<16xf32> to vector<16x1xf32>
    %178 = vector.broadcast %177 : vector<16x1xf32> to vector<16x16xf32>
    %179 = arith.subf %175, %178 : vector<16x16xf32>
    %180 = math.exp %179 : vector<16x16xf32>
    %cst_55 = arith.constant dense<0.000000e+00> : vector<16xf32>
    %181 = vector.multi_reduction <add>, %180, %cst_55 [1] : vector<16x16xf32> to vector<16xf32>
    %182 = vector.shape_cast %181 : vector<16xf32> to vector<16x1xf32>
    %183 = tpu.reciprocal %182 {approx = true} : vector<16x1xf32> -> vector<16x1xf32>
    %184 = vector.broadcast %183 : vector<16x1xf32> to vector<16x16xf32>
    %185 = arith.mulf %180, %184 : vector<16x16xf32>
    %186 = arith.truncf %185 : vector<16x16xf32> to vector<16x16xbf16>
    %187 = arith.truncf %164 : vector<16x128xf32> to vector<16x128xbf16>
    %cst_56 = arith.constant dense<0.000000e+00> : vector<16x128xf32>
    %188 = tpu.matmul %186, %187, %cst_56 {dimension_numbers = #tpu.dot_dimension_numbers<[1], [0], [0], [1], [0, 0, 1, 1], [], []>} : vector<16x16xbf16>, vector<16x128xbf16>, vector<16x128xf32> -> vector<16x128xf32>
    %189 = vector.broadcast %163 : vector<1x128xf32> to vector<16x128xf32>
    %190 = arith.addf %188, %189 : vector<16x128xf32>
    %c0_57 = arith.constant 0 : index
    %c0_58 = arith.constant 0 : index
    %191 = vector.load %arg4[%c0_57, %c0_58] : memref<16x128xf32, #tpu.memory_space<vmem>>, vector<16x128xf32>
    tpu.vector_store %arg4[%c0_57, %c0_58], %190 {strides = array<i32>} : memref<16x128xf32, #tpu.memory_space<vmem>>, vector<16x128xf32>,
    return
  }
}

</mosaic_0001>

<bundles_post_ra>
// kernel: conversation_gnn_forward.1
= control target key start
LH: loop header
LB: loop body
LE: loop exit
PB: predicated region body
PF: predicated region fallthrough
CT: control target
= control target key end

     0   :  { %9 = vsyncpa [#allocation3], 0  ;;  %s1078_s0 = inlined_call_operand.vmem [shape: s32[2,42], index: 0, kind: input, shape index: {}]   ;;  %s1079_s1 = inlined_call_operand.vmem [shape: f32[16,64], index: 1, kind: input, shape index: {}]   ;;  %s1080_s2 = inlined_call_operand.vmem [shape: f32[16,2], index: 2, kind: input, shape index: {}]   ;;  %s1081_s3 = inlined_call_operand.hbm [shape: f32[384,128], index: 3, kind: input, shape index: {}]   ;;  %s1082_s4 = inlined_call_operand.hbm [shape: f32[16,128], index: 4, kind: output, shape index: {}]  }
   0x1   :  { %10 = vsyncpa [#allocation4], 0  ;;  %s21_s17 = sshll.u32 %s1081_s3, 4  ;;  %s896_s18 = smov [#allocation2]   ;;  %s22_s17 = int_to_ptr.hbm [resolvable:$true] %s21_s17 }
   0x2   :  { %s23_s19 = sshll.u32 %s896_s18, 4  ;;  %s897_s20 = smov 128   ;;  %s24_s19 = int_to_ptr.vmem [resolvable:$true] %s23_s19 }
   0x3   :  { %s898_s21 = smov 8  }
   0x4   :  { %29 = dma.hbm_to_vmem [thread:$0]  %s22_s17, 6144, %s24_s19, [#allocation3], %s897_s20, %s897_s20, %s898_s21  }
   0x5   :  { %892 = dma.done.wait [#allocation3], 6144  }
   0x6   :  { %893 = vsyncadd [#allocation3], 4294961152  ;;  %v899_v0 = vmov 0   ;;  %v94_v1 = vld [vmem:[#allocation2 + $0x38] sm:$0xff]  ;;  %v93_v2 = vld [vmem:[#allocation2 + $0x30] sm:$0xff]  ;;  %vm100_vm0 = vcmask 523264   ;;  %v35_v50 = vlaneseq }
   0x7   :  { %784 = vset.pattern.permute.xlu0 %v899_v0  ;;  %786 = vset.pattern.permute.xlu1 %v899_v0  ;;  %v92_v3 = vld [vmem:[#allocation2 + $0x28] sm:$0xff]  ;;  %v130_v4 = vld [vmem:[%s1080_s2] sm:$0xff]  ;;  %v90_v8 = vld [vmem:[#allocation2 + $0x18] sm:$0xff]  ;;  %v900_v14 = vmov 1   ;;  %v901_v54 = vmov 0.0   ;;  %vm56_vm3 = vcmask 343040  }
   0x8   :  { %788 = vset.pattern.permute.xlu2 %v899_v0  ;;  %115 = vmatpush.msra.mxu3 %v94_v1  ;;  %v131_v5 = vld [vmem:[%s1080_s2 + $0x8] sm:$0xff]  ;;  %v91_v6 = vld [vmem:[#allocation2 + $0x20] sm:$0xff]  ;;  %v89_v10 = vld [vmem:[#allocation2 + $0x10] sm:$0xff]  ;;  %v36_v51 = vshrl.u32 %v35_v50, 7  ;;  %vm320_vm10 = vcmask 130048   ;;  %s906_s5 = smov 96  }
   0x9   :  { %134 = vperm.xlu0 %784, %v130_v4   ;;  %139 = vperm.xlu1 %786, %v131_v5   ;;  %v175_v7 = vld [vmem:[#allocation2 + $0xc8] sm:$0xff]  ;;  %v174_v9 = vld [vmem:[#allocation2 + $0xc0] sm:$0xff]  ;;  %v173_v12 = vld [vmem:[#allocation2 + $0xb8] sm:$0xff]  ;;  %s907_s6 = smov 32   ;;  %s908_s7 = smov [#allocation5]  }
   0xa   :  { %116 = vmatpush.msra.mxu3 %v93_v2  ;;  %746 = vmatpush.xpose.msk.msra.mxu2 %vm100_vm0, %v175_v7  ;;  %v88_v11 = vld [vmem:[#allocation2 + $0x8] sm:$0xff]  ;;  %v87_v13 = vld [vmem:[#allocation2] sm:$0xff]  ;;  %v172_v16 = vld [vmem:[#allocation2 + $0xb0] sm:$0xff]  ;;  %v974_v52 = vadd.s32 8, %v36_v51  ;;  %s724_s8 = sshll.u32 %s908_s7, 4  ;;  %s726_s11 = sshll.u32 %s1082_s4, 4  ;;  %s725_s8 = int_to_ptr.vmem [resolvable:$true] %s724_s8  ;;  %s727_s11 = int_to_ptr.hbm [resolvable:$true] %s726_s11 }
   0xb   :  { %v96_v15 = vld [vmem:[%s1079_s1] sm:$0xff]  ;;  %v171_v17 = vld [vmem:[#allocation2 + $0xa8] sm:$0xff]  ;;  %v169_v20 = vld [vmem:[#allocation2 + $0x98] sm:$0xff] }
   0xc   :  { %117 = vmatpush.msra.mxu3 %v92_v3  ;;  %v97_v18 = vld [vmem:[%s1079_s1 + $0x8] sm:$0xff]  ;;  %v170_v19 = vld [vmem:[#allocation2 + $0xa0] sm:$0xff]  ;;  %v168_v21 = vld [vmem:[#allocation2 + $0x90] sm:$0xff] }
   0xd   :  { %v167_v22 = vld [vmem:[#allocation2 + $0x88] sm:$0xff]  ;;  %v166_v23 = vld [vmem:[#allocation2 + $0x80] sm:$0xff]  ;;  %v165_v24 = vld [vmem:[#allocation2 + $0x78] sm:$0xff] }
   0xe   :  { %118 = vmatpush.msra.mxu3 %v91_v6  ;;  %747 = vmatpush.xpose.msk.msra.mxu2 %vm100_vm0, %v174_v9  ;;  %v164_v25 = vld [vmem:[#allocation2 + $0x70] sm:$0xff]  ;;  %v163_v26 = vld [vmem:[#allocation2 + $0x68] sm:$0xff]  ;;  %v162_v27 = vld [vmem:[#allocation2 + $0x60] sm:$0xff] }
   0xf   :  { %v161_v28 = vld [vmem:[#allocation2 + $0x58] sm:$0xff]  ;;  %v160_v29 = vld [vmem:[#allocation2 + $0x50] sm:$0xff]  ;;  %v95_v31 = vld [vmem:[#allocation2 + $0x40] sm:$0x3] }
  0x10   :  { %119 = vmatpush.msra.mxu3 %v90_v8  ;;  %v142_v33 = vperm.slane %v95_v31, 0  ;;  %v794_v34 = vld [vmem:[#allocation2 + $0x48] ss:$0 sm:$0xff]  ;;  %v155_v35 = vperm.slane %v95_v31, 1  ;;  %v795_v53 = vld [vmem:[%s1078_s0] ss:$0 sm:$0xff] }
  0x11   :  { %785 = vset.pattern.permute.xlu0 %v900_v14  ;;  %787 = vset.pattern.permute.xlu1 %v900_v14  ;;  %vm49_vm1 = vcmp.eq.s32.totalorder %v36_v51, %v795_v53  ;;  %vm50_vm2 = vcmp.eq.s32.totalorder %v974_v52, %v795_v53  ;;  %v796_v60 = vld [vmem:[%s1078_s0 + $0x1] ss:$0 sm:$0xff]  ;;  %v177_v2 = vld [vmem:[#allocation2 + $0xd8] sm:$0xf]  ;;  %v176_v3 = vld [vmem:[#allocation2 + $0xd0] sm:$0xf] }
  0x12   :  { %120 = vmatpush.msra.mxu3 %v89_v10  ;;  %148 = vperm.xlu0 %785, %v130_v4   ;;  %v741_v55 = vsel %vm49_vm1, 1.0, %v901_v54  ;;  %v742_v56 = vsel %vm50_vm2, 1.0, %v901_v54  ;;  %vm40_vm4 = vcmp.eq.s32.totalorder %v36_v51, %v796_v60  ;;  %vm41_vm5 = vcmp.eq.s32.totalorder %v974_v52, %v796_v60  ;;  %s905_s0 = smov 64  }
  0x13   :  { %152 = vperm.xlu1 %787, %v131_v5   ;;  %748 = vmatpush.xpose.msk.msra.mxu2 %vm100_vm0, %v173_v12  ;;  %v55_v57 = vpack.c.bf16 %v742_v56, %v741_v55  ;;  %v739_v61 = vsel %vm40_vm4, 1.0, %v901_v54  ;;  %v740_v62 = vsel %vm41_vm5, 1.0, %v901_v54  ;;  %v902_v4 = vmov 2  }
  0x14   :  { %121 = vmatpush.msra.mxu3 %v88_v11  ;;  %v46_v63 = vpack.c.bf16 %v740_v62, %v739_v61  ;;  %v903_v8 = vmov 3   ;;  %v78_v10 = vand.u32 127, %v35_v50 }
  0x15   :  { %v61_v58 = vsel %vm56_vm3, %v55_v57, 0 }
  0x16   :  { %122 = vmatpush.msra.mxu3 %v87_v13  ;;  %70 = vmatpush.bf16.xpose.msra.mxu0 %v61_v58  ;;  %vm81_vm7 = vcmp.eq.s32.totalorder %v36_v51, %v78_v10  ;;  %vm82_vm12 = vcmp.eq.s32.totalorder %v974_v52, %v78_v10 }
  0x17   :  { %744 = vmatmul.msk.f32.vlgmr.msra.gmra.mxu3 %vm100_vm0, %v96_v15  ;;  %749 = vmatpush.xpose.msk.msra.mxu2 %vm100_vm0, %v172_v16 }
  0x1b   :  { %750 = vmatpush.xpose.msk.msra.mxu2 %vm100_vm0, %v171_v17  ;;  %789 = vset.pattern.permute.xlu1 %v902_v4 }
  0x1d   :  { %743 = vmatmul.msk.bf16.vlgmr.msra.gmra.mxu0 %vm56_vm3, %v46_v63 }
  0x1f   :  { %745 = vmatmul.msk.f32.gmra.mxu3 %vm100_vm0, %v97_v18  ;;  %751 = vmatpush.xpose.msk.msra.mxu2 %vm100_vm0, %v170_v19 }
  0x23   :  { %752 = vmatpush.xpose.msk.msra.mxu2 %vm100_vm0, %v169_v20 }
  0x27   :  { %753 = vmatpush.xpose.msk.msra.mxu2 %vm100_vm0, %v168_v21 }
  0x2b   :  { %754 = vmatpush.xpose.msk.msra.mxu2 %vm100_vm0, %v167_v22 }
  0x2f   :  { %755 = vmatpush.xpose.msk.msra.mxu2 %vm100_vm0, %v166_v23 }
  0x33   :  { %756 = vmatpush.xpose.msk.msra.mxu2 %vm100_vm0, %v165_v24 }
  0x37   :  { %757 = vmatpush.xpose.msk.msra.mxu2 %vm100_vm0, %v164_v25 }
  0x3b   :  { %758 = vmatpush.xpose.msk.msra.mxu2 %vm100_vm0, %v163_v26 }
  0x3f   :  { %759 = vmatpush.xpose.msk.msra.mxu2 %vm100_vm0, %v162_v27 }
  0x43   :  { %760 = vmatpush.xpose.msk.msra.mxu2 %vm100_vm0, %v161_v28 }
  0x47   :  { %761 = vmatpush.xpose.msk.msra.mxu2 %vm100_vm0, %v160_v29 }
  0x7b   :  { %v135_v30 = vpop.permute.xlu0 %134  ;;  %v140_v32 = vpop.permute.xlu1 %139 }
  0x7c   :  { %v143_v38 = vmul.f32 %v142_v33, %v135_v30  ;;  %v144_v45 = vmul.f32 %v142_v33, %v140_v32 }
  0x84   :  { %v149_v36 = vpop.permute.xlu0 %148 }
  0x85   :  { %v156_v40 = vmul.f32 %v155_v35, %v149_v36  ;;  %v153_v43 = vpop.permute.xlu1 %152 }
  0x86   :  { %v157_v47 = vmul.f32 %v155_v35, %v153_v43 }
  0x9a   :  { %v124_v37 = vpop.f32.mrf.mxu3  ;;  %v72_v9 = vpop.f32.mrf.mxu0 }
  0x9b   :  { %v125_v39 = vadd.f32 %v794_v34, %v124_v37  ;;  %vm79_vm6 = vcmp.gt.f32.partialorder %v72_v9, 0.5 }
  0x9c   :  { %vm83_vm8 = vmor %vm79_vm6, %vm81_vm7  ;;  %vm573_vm6 = vcmask 261120   ;;  %vm578_vm7 = vcmask 785408  }
  0x9d   :  { %v145_v41 = vadd.f32 %v143_v38, %v125_v39 }
  0x9f   :  { %v158_v42 = vadd.f32 %v156_v40, %v145_v41 }
  0xa1   :  { %762 = vmatmul.msk.f32.vlgmr.msra.gmra.mxu2 %vm100_vm0, %v158_v42 }
  0xa2   :  { %v127_v44 = vpop.f32.mrf.mxu3  ;;  %v74_v15 = vpop.f32.mrf.mxu0 }
  0xa3   :  { %v128_v46 = vadd.f32 %v794_v34, %v127_v44  ;;  %vm80_vm11 = vcmp.gt.f32.partialorder %v74_v15, 0.5 }
  0xa4   :  { %vm84_vm13 = vmor %vm80_vm11, %vm82_vm12 }
  0xa5   :  { %v146_v48 = vadd.f32 %v144_v45, %v128_v46 }
  0xa7   :  { %v159_v49 = vadd.f32 %v157_v47, %v146_v48 }
  0xa9   :  { %763 = vmatmul.msk.f32.gmra.mxu2 %vm100_vm0, %v159_v49 }
 0x124   :  { %v250_v59 = vpop.f32.mrf.mxu2 }
 0x12c   :  { %v253_v0 = vpop.f32.mrf.mxu2 }
 0x12d   :  { %v984_v1 = vpack.c.bf16 %v253_v0, %v250_v59  ;;  %270 = vmatpush.xpose.msrb.mxu3 %v253_v0 }
 0x12f   :  { %355 = vmatpush.bf16.msrb.mxu0 %v984_v1 }
 0x131   :  { %271 = vmatpush.xpose.msrb.mxu3 %v250_v59 }
 0x134   :  { %272 = vmatmul.f32.vlgmr.msrb.gmra.mxu3 %v176_v3 }
 0x135   :  { %291 = vmatpush.xpose.msra.mxu3 %v177_v2 }
 0x13c   :  { %292 = vmatmul.f32.vlgmr.msra.gmra.mxu3 %v250_v59 }
 0x144   :  { %295 = vmatmul.f32.gmra.mxu3 %v253_v0 }
 0x1b7   :  { %v987_v5 = vpop.f32.mrf.mxu3 }
 0x1b8   :  { %v309_v11 = vperm.slane %v987_v5, 0  ;;  %v433_v27 = vperm.slane %v987_v5, 2  ;;  %v370_v32 = vperm.slane %v987_v5, 1  ;;  %v495_v39 = vperm.slane %v987_v5, 3 }
 0x1bf   :  { %v293_v6 = vpop.f32.mrf.mxu3 }
 0x1c0   :  { %363 = vperm.xlu0 %785, %v293_v6   ;;  %426 = vperm.xlu1 %789, %v293_v6  }
 0x1c1   :  { %301 = vperm.xlu2 %788, %v293_v6  }
 0x1c7   :  { %v296_v7 = vpop.f32.mrf.mxu3 }
 0x1c8   :  { %793 = vset.pattern.permute.xlu0 %v903_v8  ;;  %791 = vset.pattern.permute.xlu1 %v900_v14  ;;  %v904_v14 = vmov -1e+30  }
 0x1c9   :  { %306 = vperm.xlu2 %788, %v296_v7   ;;  %492 = vperm.xlu0 %793, %v296_v7   ;;  %v991_v17 = vsel %vm83_vm8, 0.0, %v904_v14  ;;  %v999_v24 = vsel %vm84_vm13, 0.0, %v904_v14 }
 0x1ca   :  { %367 = vperm.xlu1 %791, %v296_v7  }
 0x1d1   :  { %790 = vset.pattern.permute.xlu2 %v902_v4 }
 0x1d2   :  { %430 = vperm.xlu2 %790, %v296_v7  }
 0x1da   :  { %792 = vset.pattern.permute.xlu2 %v903_v8 }
 0x1db   :  { %488 = vperm.xlu2 %792, %v293_v6  }
 0x21b   :  { %v302_v12 = vpop.permute.xlu2 %301 }
 0x21c   :  { %v310_v13 = vadd.f32 %v309_v11, %v302_v12 }
 0x21e   :  { %vm312_vm9 = vcmp.ge.f32.partialorder %v310_v13, 0.0  ;;  %v314_v16 = vmul.f32 0.2, %v310_v13 }
 0x220   :  { %v316_v18 = vsel %vm312_vm9, %v310_v13, %v314_v16 }
 0x221   :  { %v995_v19 = vadd.f32 %v316_v18, %v991_v17 }
 0x223   :  { %v307_v20 = vpop.permute.xlu2 %306  ;;  %v321_v21 = vsel %vm320_vm10, %v995_v19, -inf }
 0x224   :  { %v311_v22 = vadd.f32 %v309_v11, %v307_v20  ;;  %322 = vmax.xlane.f32.xlu1 %v321_v21 }
 0x226   :  { %vm313_vm14 = vcmp.ge.f32.partialorder %v311_v22, 0.0  ;;  %v315_v23 = vmul.f32 0.2, %v311_v22 }
 0x228   :  { %v317_v25 = vsel %vm313_vm14, %v311_v22, %v315_v23 }
 0x229   :  { %v1002_v26 = vadd.f32 %v317_v25, %v999_v24 }
 0x22b   :  { %v324_v28 = vsel %vm320_vm10, %v1002_v26, -inf }
 0x22c   :  { %v431_v29 = vpop.permute.xlu2 %430  ;;  %325 = vmax.xlane.f32.xlu2 %v324_v28 }
 0x22d   :  { %v435_v30 = vadd.f32 %v433_v27, %v431_v29 }
 0x22f   :  { %vm437_vm15 = vcmp.ge.f32.partialorder %v435_v30, 0.0  ;;  %v439_v31 = vmul.f32 0.2, %v435_v30 }
 0x231   :  { %v441_v33 = vsel %vm437_vm15, %v435_v30, %v439_v31 }
 0x232   :  { %v364_v34 = vpop.permute.xlu0 %363  ;;  %v427_v35 = vpop.permute.xlu1 %426  ;;  %v1009_v36 = vadd.f32 %v441_v33, %v999_v24 }
 0x233   :  { %v371_v37 = vadd.f32 %v370_v32, %v364_v34  ;;  %v434_v38 = vadd.f32 %v433_v27, %v427_v35 }
 0x234   :  { %v447_v40 = vsel %vm320_vm10, %v1009_v36, -inf }
 0x235   :  { %vm373_vm1 = vcmp.ge.f32.partialorder %v371_v37, 0.0  ;;  %v375_v41 = vmul.f32 0.2, %v371_v37  ;;  %vm436_vm2 = vcmp.ge.f32.partialorder %v434_v38, 0.0  ;;  %v438_v42 = vmul.f32 0.2, %v434_v38  ;;  %v489_v43 = vpop.permute.xlu2 %488  ;;  %448 = vmax.xlane.f32.xlu2 %v447_v40 }
 0x236   :  { %v496_v44 = vadd.f32 %v495_v39, %v489_v43 }
 0x237   :  { %v440_v45 = vsel %vm436_vm2, %v434_v38, %v438_v42  ;;  %v377_v46 = vsel %vm373_vm1, %v371_v37, %v375_v41 }
 0x238   :  { %vm498_vm3 = vcmp.ge.f32.partialorder %v496_v44, 0.0  ;;  %v500_v47 = vmul.f32 0.2, %v496_v44  ;;  %v442_v48 = vadd.f32 %v440_v45, %v991_v17  ;;  %v379_v49 = vadd.f32 %v377_v46, %v991_v17 }
 0x23a   :  { %v444_v50 = vsel %vm320_vm10, %v442_v48, -inf  ;;  %v381_v51 = vsel %vm320_vm10, %v379_v49, -inf  ;;  %v502_v53 = vsel %vm498_vm3, %v496_v44, %v500_v47 }
 0x23b   :  { %v493_v52 = vpop.permute.xlu0 %492  ;;  %445 = vmax.xlane.f32.xlu0 %v444_v50  ;;  %382 = vmax.xlane.f32.xlu1 %v381_v51  ;;  %v504_v57 = vadd.f32 %v502_v53, %v991_v17 }
 0x23c   :  { %v368_v54 = vpop.permute.xlu1 %367  ;;  %v497_v55 = vadd.f32 %v495_v39, %v493_v52 }
 0x23d   :  { %v372_v56 = vadd.f32 %v370_v32, %v368_v54  ;;  %v506_v61 = vsel %vm320_vm10, %v504_v57, -inf }
 0x23e   :  { %v501_v59 = vmul.f32 0.2, %v497_v55  ;;  %vm499_vm5 = vcmp.ge.f32.partialorder %v497_v55, 0.0 }
 0x23f   :  { %vm374_vm4 = vcmp.ge.f32.partialorder %v372_v56, 0.0  ;;  %v376_v58 = vmul.f32 0.2, %v372_v56 }
 0x240   :  { %v503_v0 = vsel %vm499_vm5, %v497_v55, %v501_v59 }
 0x241   :  { %v378_v60 = vsel %vm374_vm4, %v372_v56, %v376_v58  ;;  %v505_v2 = vadd.f32 %v503_v0, %v999_v24 }
 0x242   :  { %v380_v62 = vadd.f32 %v378_v60, %v999_v24 }
 0x243   :  { %507 = vmax.xlane.f32.xlu1 %v506_v61  ;;  %v509_v3 = vsel %vm320_vm10, %v505_v2, -inf }
 0x244   :  { %v384_v63 = vsel %vm320_vm10, %v380_v62, -inf }
 0x245   :  { %385 = vmax.xlane.f32.xlu2 %v384_v63 }
 0x24d   :  { %510 = vmax.xlane.f32.xlu2 %v509_v3 }
 0x297   :  { %v323_v4 = vpop.xlane.xlu1 %322 }
 0x298   :  { %v327_v5 = vsub.f32 %v995_v19, %v323_v4 }
 0x29a   :  { %v329_v6 = vmul.f32 1.442695, %v327_v5 }
 0x29c   :  { %800 = vpow2.f32 %v329_v6 }
 0x29f   :  { %v326_v9 = vpop.xlane.xlu2 %325 }
 0x2a0   :  { %v328_v18 = vsub.f32 %v1002_v26, %v326_v9 }
 0x2a2   :  { %v1025_v7 = vpop.eup %800  ;;  %v331_v19 = vmul.f32 1.442695, %v328_v18 }
 0x2a3   :  { %v333_v8 = vsel %vm320_vm10, %v1025_v7, 0.0 }
 0x2a4   :  { %334 = vadd.xlane.f32.xlu0 %v333_v8 }
 0x2a8   :  { %v449_v15 = vpop.xlane.xlu2 %448 }
 0x2a9   :  { %v451_v25 = vsub.f32 %v1009_v36, %v449_v15  ;;  %v610_v15 = vld [vmem:[#allocation2 + $0x158] sm:$0xff] }
 0x2ab   :  { %v454_v32 = vmul.f32 1.442695, %v451_v25 }
 0x2ae   :  { %v446_v10 = vpop.xlane.xlu0 %445  ;;  %v383_v11 = vpop.xlane.xlu1 %382 }
 0x2af   :  { %v450_v12 = vsub.f32 %v442_v48, %v446_v10  ;;  %v387_v13 = vsub.f32 %v379_v49, %v383_v11 }
 0x2b1   :  { %v452_v16 = vmul.f32 1.442695, %v450_v12  ;;  %v389_v14 = vmul.f32 1.442695, %v387_v13  ;;  %v611_v13 = vld [vmem:[#allocation2 + $0x160] sm:$0xff] }
 0x2b3   :  { %802 = vpow2.f32 %v452_v16 }
 0x2b4   :  { %804 = vpow2.f32 %v389_v14  ;;  %v609_v14 = vld [vmem:[#allocation2 + $0x150] sm:$0xff] }
 0x2b5   :  { %806 = vpow2.f32 %v331_v19 }
 0x2b6   :  { %v508_v20 = vpop.xlane.xlu1 %507 }
 0x2b7   :  { %v512_v21 = vsub.f32 %v504_v57, %v508_v20 }
 0x2b8   :  { %v386_v22 = vpop.xlane.xlu2 %385 }
 0x2b9   :  { %v803_v23 = vpop.eup %802  ;;  %v514_v27 = vmul.f32 1.442695, %v512_v21  ;;  %v388_v28 = vsub.f32 %v380_v62, %v386_v22 }
 0x2ba   :  { %v1031_v29 = vpop.eup %804  ;;  %v456_v30 = vsel %vm320_vm10, %v803_v23, 0.0 }
 0x2bb   :  { %808 = vpow2.f32 %v514_v27  ;;  %v391_v31 = vmul.f32 1.442695, %v388_v28  ;;  %v393_v26 = vsel %vm320_vm10, %v1031_v29, 0.0  ;;  %457 = vadd.xlane.f32.xlu2 %v456_v30  ;;  %v807_v33 = vpop.eup %806  ;;  %v608_v27 = vld [vmem:[#allocation2 + $0x148] sm:$0xff]  ;;  %v607_v28 = vld [vmem:[#allocation2 + $0x140] sm:$0xff]  ;;  %v605_v30 = vld [vmem:[#allocation2 + $0x130] sm:$0xff] }
 0x2bc   :  { %394 = vadd.xlane.f32.xlu1 %v393_v26  ;;  %v336_v40 = vsel %vm320_vm10, %v807_v33, 0.0  ;;  %v603_v26 = vld [vmem:[#allocation2 + $0x120] sm:$0xff] }
 0x2bd   :  { %810 = vpow2.f32 %v391_v31  ;;  %v604_v31 = vld [vmem:[#allocation2 + $0x128] sm:$0xff] }
 0x2be   :  { %812 = vpow2.f32 %v454_v32  ;;  %v602_v32 = vld [vmem:[#allocation2 + $0x118] sm:$0xff] }
 0x2c0   :  { %v511_v34 = vpop.xlane.xlu2 %510 }
 0x2c1   :  { %v1036_v35 = vpop.eup %808  ;;  %v513_v36 = vsub.f32 %v505_v2, %v511_v34  ;;  %v600_v34 = vld [vmem:[#allocation2 + $0x108] sm:$0xff] }
 0x2c2   :  { %v518_v37 = vsel %vm320_vm10, %v1036_v35, 0.0 }
 0x2c3   :  { %v811_v38 = vpop.eup %810  ;;  %v516_v39 = vmul.f32 1.442695, %v513_v36  ;;  %519 = vadd.xlane.f32.xlu0 %v518_v37  ;;  %v598_v36 = vld [vmem:[#allocation2 + $0xf8] sm:$0xff]  ;;  %v597_v37 = vld [vmem:[#allocation2 + $0xf0] sm:$0xff] }
 0x2c4   :  { %337 = vadd.xlane.f32.xlu1 %v336_v40  ;;  %v396_v41 = vsel %vm320_vm10, %v811_v38, 0.0  ;;  %v813_v42 = vpop.eup %812 }
 0x2c5   :  { %814 = vpow2.f32 %v516_v39  ;;  %397 = vadd.xlane.f32.xlu2 %v396_v41  ;;  %v459_v43 = vsel %vm320_vm10, %v813_v42, 0.0 }
 0x2cb   :  { %v815_v44 = vpop.eup %814  ;;  %460 = vadd.xlane.f32.xlu0 %v459_v43 }
 0x2cc   :  { %v521_v45 = vsel %vm320_vm10, %v815_v44, 0.0 }
 0x2cd   :  { %522 = vadd.xlane.f32.xlu1 %v521_v45 }
 0x2dd   :  { %467 = vrot.lane.b32.xlu2 %v984_v1, %s905_s0 }
 0x2df   :  { %405 = vrot.lane.b32.xlu0 %v984_v1, %s906_s5 }
 0x2e6   :  { %529 = vrot.lane.b32.xlu1 %v984_v1, %s907_s6 }
 0x317   :  { %v335_v46 = vpop.xlane.xlu0 %334 }
 0x318   :  { %816 = vrcp.f32 %v335_v46 }
 0x31e   :  { %v817_v52 = vpop.eup %816 }
 0x31f   :  { %v341_v55 = vmul.f32 %v817_v52, %v1025_v7 }
 0x32e   :  { %v458_v47 = vpop.xlane.xlu2 %457 }
 0x32f   :  { %v395_v48 = vpop.xlane.xlu1 %394 }
 0x336   :  { %v520_v49 = vpop.xlane.xlu0 %519 }
 0x337   :  { %v338_v50 = vpop.xlane.xlu1 %337 }
 0x338   :  { %818 = vrcp.f32 %v338_v50  ;;  %v398_v51 = vpop.xlane.xlu2 %397 }
 0x339   :  { %820 = vrcp.f32 %v458_v47 }
 0x33e   :  { %v819_v53 = vpop.eup %818  ;;  %v461_v54 = vpop.xlane.xlu0 %460 }
 0x33f   :  { %v342_v56 = vmul.f32 %v819_v53, %v807_v33  ;;  %822 = vrcp.f32 %v461_v54  ;;  %v821_v1 = vpop.eup %820  ;;  %v601_v33 = vld [vmem:[#allocation2 + $0x110] sm:$0xff] }
 0x340   :  { %v468_v57 = vpop.permute.xlu2 %467  ;;  %v464_v60 = vmul.f32 %v821_v1, %v803_v23  ;;  %824 = vrcp.f32 %v398_v51  ;;  %v523_v63 = vpop.xlane.xlu1 %522 }
 0x341   :  { %480 = vmatpush.bf16.msrb.mxu3 %v468_v57  ;;  %v343_v58 = vpack.c.bf16 %v342_v56, %v341_v55  ;;  %826 = vrcp.f32 %v395_v48 }
 0x342   :  { %828 = vrcp.f32 %v523_v63  ;;  %v798_v63 = vld [vmem:[#allocation2 + $0x170] ss:$0 sm:$0xff] }
 0x343   :  { %764 = vmatmul.msk.bf16.vlgmr.msrb.gmra.mxu0 %vm320_vm10, %v343_v58  ;;  %830 = vrcp.f32 %v520_v49 }
 0x345   :  { %v823_v59 = vpop.eup %822 }
 0x346   :  { %v465_v61 = vmul.f32 %v823_v59, %v813_v42  ;;  %v825_v0 = vpop.eup %824  ;;  %v797_v42 = vld [vmem:[#allocation2 + $0xe0] ss:$0 sm:$0xff] }
 0x347   :  { %v827_v2 = vpop.eup %826  ;;  %v402_v3 = vmul.f32 %v825_v0, %v811_v38  ;;  %v596_v38 = vld [vmem:[#allocation2 + $0xe8] sm:$0xff] }
 0x348   :  { %v466_v62 = vpack.c.bf16 %v465_v61, %v464_v60  ;;  %v401_v5 = vmul.f32 %v827_v2, %v1031_v29  ;;  %v829_v6 = vpop.eup %828  ;;  %v606_v29 = vld [vmem:[#allocation2 + $0x138] sm:$0xff] }
 0x349   :  { %v831_v8 = vpop.eup %830  ;;  %v527_v9 = vmul.f32 %v829_v6, %v815_v44  ;;  %v612_v6 = vld [vmem:[#allocation2 + $0x168] sm:$0x1] }
 0x34a   :  { %766 = vmatmul.msk.bf16.vlgmr.msrb.gmra.mxu3 %vm320_vm10, %v466_v62  ;;  %v403_v7 = vpack.c.bf16 %v402_v3, %v401_v5  ;;  %v526_v10 = vmul.f32 %v831_v8, %v1036_v35  ;;  %v599_v35 = vld [vmem:[#allocation2 + $0x100] sm:$0xff] }
 0x34c   :  { %v528_v12 = vpack.c.bf16 %v527_v9, %v526_v10 }
 0x351   :  { %v406_v4 = vpop.permute.xlu0 %405 }
 0x352   :  { %418 = vmatpush.bf16.msra.mxu1 %v406_v4 }
 0x355   :  { %765 = vmatmul.msk.bf16.vlgmr.msra.gmra.mxu1 %vm320_vm10, %v403_v7 }
 0x356   :  { %615 = vmatpush.xpose.msrb.mxu1 %v611_v13 }
 0x358   :  { %v530_v11 = vpop.permute.xlu1 %529 }
 0x359   :  { %542 = vmatpush.bf16.msra.mxu0 %v530_v11 }
 0x35a   :  { %616 = vmatpush.xpose.msrb.mxu1 %v610_v15 }
 0x35c   :  { %767 = vmatmul.msk.bf16.vlgmr.msra.gmra.mxu0 %vm320_vm10, %v528_v12 }
 0x35e   :  { %617 = vmatpush.xpose.msrb.mxu1 %v609_v14 }
 0x362   :  { %618 = vmatpush.xpose.msrb.mxu1 %v608_v27 }
 0x366   :  { %619 = vmatpush.xpose.msrb.mxu1 %v607_v28 }
 0x36a   :  { %620 = vmatpush.xpose.msrb.mxu1 %v606_v29 }
 0x36e   :  { %621 = vmatpush.xpose.msrb.mxu1 %v605_v30 }
 0x372   :  { %622 = vmatpush.xpose.msrb.mxu1 %v604_v31 }
 0x376   :  { %623 = vmatpush.xpose.msrb.mxu1 %v603_v26 }
 0x37a   :  { %624 = vmatpush.xpose.msrb.mxu1 %v602_v32 }
 0x37e   :  { %625 = vmatpush.xpose.msrb.mxu1 %v601_v33 }
 0x382   :  { %626 = vmatpush.xpose.msrb.mxu1 %v600_v34 }
 0x386   :  { %627 = vmatpush.xpose.msrb.mxu1 %v599_v35 }
 0x38a   :  { %628 = vmatpush.xpose.msrb.mxu1 %v598_v36 }
 0x38e   :  { %629 = vmatpush.xpose.msrb.mxu1 %v597_v37 }
 0x392   :  { %630 = vmatpush.xpose.msrb.mxu1 %v596_v38  ;;  %v799_v38 = vld [vmem:[#allocation2 + $0x178] ss:$0 sm:$0xff] }
 0x3c0   :  { %v357_v16 = vpop.f32.mrf.mxu0 }
 0x3c8   :  { %v359_v19 = vpop.f32.mrf.mxu0 }
 0x3cd   :  { %v482_v18 = vpop.f32.mrf.mxu3 }
 0x3ce   :  { %559 = vrot.lane.b32.xlu2 %v482_v18, %s905_s0 }
 0x3d2   :  { %v420_v20 = vpop.f32.mrf.mxu1 }
 0x3d3   :  { %551 = vrot.lane.b32.xlu0 %v420_v20, %s907_s6 }
 0x3d5   :  { %v484_v21 = vpop.f32.mrf.mxu3 }
 0x3d6   :  { %561 = vrot.lane.b32.xlu2 %v484_v21, %s905_s0 }
 0x3d9   :  { %v544_v22 = vpop.f32.mrf.mxu0 }
 0x3da   :  { %567 = vrot.lane.b32.xlu1 %v544_v22, %s906_s5  ;;  %v422_v23 = vpop.f32.mrf.mxu1 }
 0x3db   :  { %553 = vrot.lane.b32.xlu0 %v422_v23, %s907_s6 }
 0x3e1   :  { %v546_v25 = vpop.f32.mrf.mxu0 }
 0x3e2   :  { %569 = vrot.lane.b32.xlu1 %v546_v25, %s906_s5 }
 0x428   :  { %v560_v40 = vpop.permute.xlu2 %559 }
 0x430   :  { %v562_v51 = vpop.permute.xlu2 %561 }
 0x445   :  { %v552_v39 = vpop.permute.xlu0 %551 }
 0x446   :  { %v574_v41 = vsel %vm573_vm6, %v357_v16, %v552_v39 }
 0x447   :  { %v576_v44 = vsel %vm100_vm0, %v574_v41, %v560_v40 }
 0x44c   :  { %v568_v43 = vpop.permute.xlu1 %567 }
 0x44d   :  { %v579_v45 = vsel %vm578_vm7, %v576_v44, %v568_v43  ;;  %v554_v47 = vpop.permute.xlu0 %553 }
 0x44e   :  { %v582_v46 = vadd.f32 %v797_v42, %v579_v45  ;;  %v575_v49 = vsel %vm573_vm6, %v359_v19, %v554_v47 }
 0x44f   :  { %v577_v53 = vsel %vm100_vm0, %v575_v49, %v562_v51 }
 0x450   :  { %v586_v48 = vmin.f32 %v582_v46, 0.0  ;;  %vm584_vm8 = vcmp.gt.f32.partialorder %v582_v46, 0.0 }
 0x452   :  { %v588_v50 = vmul.f32 1.442695, %v586_v48 }
 0x454   :  { %v570_v52 = vpop.permute.xlu1 %569  ;;  %832 = vpow2.f32 %v588_v50 }
 0x455   :  { %v580_v54 = vsel %vm578_vm7, %v577_v53, %v570_v52 }
 0x456   :  { %v583_v55 = vadd.f32 %v797_v42, %v580_v54 }
 0x458   :  { %v587_v56 = vmin.f32 %v583_v55, 0.0  ;;  %vm585_vm9 = vcmp.gt.f32.partialorder %v583_v55, 0.0 }
 0x45a   :  { %v833_v57 = vpop.eup %832  ;;  %v590_v58 = vmul.f32 1.442695, %v587_v56 }
 0x45b   :  { %v768_v1 = vadd.f32 -1.0, %v833_v57 }
 0x45c   :  { %834 = vpow2.f32 %v590_v58 }
 0x45d   :  { %v594_v59 = vsel %vm584_vm8, %v582_v46, %v768_v1 }
 0x45e   :  { %631 = vmatmul.f32.vlgmr.msrb.gmra.mxu1 %v594_v59 }
 0x462   :  { %v835_v60 = vpop.eup %834 }
 0x463   :  { %v769_v61 = vadd.f32 -1.0, %v835_v60 }
 0x465   :  { %v595_v62 = vsel %vm585_vm9, %v583_v55, %v769_v61 }
 0x466   :  { %634 = vmatmul.f32.gmra.mxu1 %v595_v62 }
 0x4db   :  { %v632_v0 = vpop.f32.mrf.mxu1 }
 0x4dc   :  { %v659_v2 = vmul.f32 %v798_v63, %v632_v0 }
 0x4de   :  { %661 = vadd.xlane.f32.xlu0 %v659_v2 }
 0x4e3   :  { %v635_v3 = vpop.f32.mrf.mxu1 }
 0x4e4   :  { %v699_v4 = vpack.c.bf16 %v635_v3, %v632_v0  ;;  %652 = vmatpush.xpose.msra.mxu3 %v635_v3  ;;  %v660_v5 = vmul.f32 %v798_v63, %v635_v3 }
 0x4e6   :  { %711 = vmatpush.bf16.msrb.mxu0 %v699_v4  ;;  %663 = vadd.xlane.f32.xlu2 %v660_v5 }
 0x4e8   :  { %653 = vmatpush.xpose.msra.mxu3 %v632_v0 }
 0x4eb   :  { %654 = vmatmul.f32.vlgmr.msra.gmra.mxu3 %v612_v6 }
 0x551   :  { %v662_v9 = vpop.xlane.xlu0 %661 }
 0x559   :  { %v664_v10 = vpop.xlane.xlu2 %663 }
 0x56e   :  { %v655_v7 = vpop.f32.mrf.mxu3 }
 0x56f   :  { %v665_v8 = vperm.slane %v655_v7, 0 }
 0x571   :  { %v666_v11 = vadd.f32 %v665_v8, %v662_v9  ;;  %v667_v12 = vadd.f32 %v665_v8, %v664_v10 }
 0x573   :  { %v670_v13 = vmul.f32 0.2, %v666_v11  ;;  %v671_v15 = vmul.f32 0.2, %v667_v12  ;;  %vm669_vm0 = vcmp.ge.f32.partialorder %v667_v12, 0.0  ;;  %vm668_vm11 = vcmp.ge.f32.partialorder %v666_v11, 0.0 }
 0x575   :  { %v673_v16 = vsel %vm669_vm0, %v667_v12, %v671_v15  ;;  %v672_v14 = vsel %vm668_vm11, %v666_v11, %v670_v13 }
 0x576   :  { %v675_v18 = vadd.f32 %v673_v16, %v999_v24  ;;  %v674_v19 = vadd.f32 %v672_v14, %v991_v17 }
 0x578   :  { %v679_v20 = vsel %vm320_vm10, %v675_v18, -inf  ;;  %v676_v21 = vsel %vm320_vm10, %v674_v19, -inf }
 0x579   :  { %680 = vmax.xlane.f32.xlu0 %v679_v20  ;;  %677 = vmax.xlane.f32.xlu1 %v676_v21 }
 0x5ec   :  { %v681_v22 = vpop.xlane.xlu0 %680  ;;  %v678_v23 = vpop.xlane.xlu1 %677 }
 0x5ed   :  { %v683_v25 = vsub.f32 %v675_v18, %v681_v22  ;;  %v682_v27 = vsub.f32 %v674_v19, %v678_v23 }
 0x5ef   :  { %v686_v28 = vmul.f32 1.442695, %v683_v25  ;;  %v684_v29 = vmul.f32 1.442695, %v682_v27 }
 0x5f1   :  { %836 = vpow2.f32 %v686_v28 }
 0x5f2   :  { %838 = vpow2.f32 %v684_v29 }
 0x5f7   :  { %v837_v30 = vpop.eup %836 }
 0x5f8   :  { %v839_v31 = vpop.eup %838  ;;  %v691_v24 = vsel %vm320_vm10, %v837_v30, 0.0 }
 0x5f9   :  { %692 = vadd.xlane.f32.xlu1 %v691_v24  ;;  %v688_v17 = vsel %vm320_vm10, %v839_v31, 0.0 }
 0x5fa   :  { %689 = vadd.xlane.f32.xlu2 %v688_v17 }
 0x66c   :  { %v693_v26 = vpop.xlane.xlu1 %692 }
 0x66d   :  { %v690_v32 = vpop.xlane.xlu2 %689  ;;  %840 = vrcp.f32 %v693_v26 }
 0x66e   :  { %842 = vrcp.f32 %v690_v32 }
 0x673   :  { %v841_v33 = vpop.eup %840 }
 0x674   :  { %v843_v34 = vpop.eup %842  ;;  %v697_v35 = vmul.f32 %v841_v33, %v837_v30 }
 0x675   :  { %v696_v36 = vmul.f32 %v843_v34, %v839_v31 }
 0x677   :  { %v698_v37 = vpack.c.bf16 %v697_v35, %v696_v36 }
 0x679   :  { %770 = vmatmul.msk.bf16.vlgmr.msrb.gmra.mxu0 %vm320_vm10, %v698_v37 }
 0x6f6   :  { %v713_v39 = vpop.f32.mrf.mxu0 }
 0x6f7   :  { %v714_v40 = vadd.f32 %v799_v38, %v713_v39 }
 0x6f9   :  { %718 = vst [vmem:[#allocation5] sm:$0xff] %v714_v40 }
 0x6fe   :  { %v715_v41 = vpop.f32.mrf.mxu0 }
 0x6ff   :  { %v716_v42 = vadd.f32 %v799_v38, %v715_v41 }
 0x701   :  { %719 = vst [vmem:[#allocation5 + $0x8] sm:$0xff] %v716_v42 }
 0x702   :  { %732 = dma.vmem_to_hbm [thread:$0]  %s725_s8, 256, %s727_s11, [#allocation4], %s897_s20, %s897_s20, %s898_s21  }
 0x703   :  { %894 = dma.done.wait [#allocation4], 256  }
 0x704   :  { %895 = vsyncadd [#allocation4], 4294967040 }
 0x705   :  { %737 = vsyncpa [#allocation3], 1 }
 0x706   :  { %738 = vsyncpa [#allocation4], 1 }

</bundles_post_ra>
